<compile_context>
chip_gen: v7x
topology: tpu7x:2x2x1
jax: 0.10.0
libtpu: 0.0.40
codegen_flags: <defaults>
</compile_context>

<pallas_src>
import jax
import jax.numpy as jnp
from jax import lax
from jax.experimental import pallas as pl
from jax.experimental.pallas import tpu as pltpu

# Problem sizes (small, synthetic, deterministic)
VOCAB_SIZE = 64
EMBED_DIM = 128
BAGS_PER_BLOCK = 8                                   # output tile rows (sublane-aligned)
BAG_LENGTHS = [3, 2, 0, 5, 4, 1, 3, 2, 4, 0, 3, 5, 2, 1, 4, 3]   # includes empty bags
NUM_BAGS = len(BAG_LENGTHS)                          # 16  -> grid of 2 tiles
TOTAL_INDICES = sum(BAG_LENGTHS)                     # 42


def _emb_bag_kernel(text_ref, bag_ref, emb_ref, o_ref):
    # text_ref : VMEM [1, L]  int32   flat indices, padded (pad value irrelevant)
    # bag_ref  : VMEM [1, L]  int32   bag id per flat index, padding = -1
    # emb_ref  : VMEM [V, D]  f32     full embedding table (resident)
    # o_ref    : VMEM [BPB, D] f32    output tile for bags [g*BPB, (g+1)*BPB)
    bpb, _ = o_ref.shape
    vocab = emb_ref.shape[0]
    length = text_ref.shape[1]

    bag_base = pl.program_id(0) * bpb

    # [BPB, L] bag-membership one-hot (VPU compare, lane-dense along L).
    bag_rows = lax.broadcasted_iota(jnp.int32, (bpb, length), 0) + bag_base
    bag_onehot = (bag_rows == bag_ref[...]).astype(jnp.float32)

    # [V, L] vocab one-hot of every flat index.
    vocab_rows = lax.broadcasted_iota(jnp.int32, (vocab, length), 0)
    vocab_onehot = (vocab_rows == text_ref[...]).astype(jnp.float32)

    # counts[j, v] = #{ i : bag(i) == g*BPB+j  and  text[i] == v }   (MXU, contract L)
    counts = lax.dot_general(
        bag_onehot, vocab_onehot,
        dimension_numbers=(((1,), (1,)), ((), ())),
        preferred_element_type=jnp.float32,
    )

    # Whole output tile in one MXU matmul + one unmasked full-tile store.
    o_ref[...] = jnp.dot(counts, emb_ref[...], preferred_element_type=jnp.float32)


def embedding_bag_sum(text, offsets, emb_table, *, bags_per_block=BAGS_PER_BLOCK):
    """Pallas equivalent of nn.EmbeddingBag(mode='sum')(text, offsets)."""
    total = text.shape[0]
    num_bags = offsets.shape[0]
    vocab, dim = emb_table.shape
    assert num_bags % bags_per_block == 0, "ragged last bag tile not handled (toy sizes)"

    offsets = offsets.astype(jnp.int32)
    # include_last_offset=False semantics: last bag runs to len(text).
    ends = jnp.concatenate([offsets[1:], jnp.array([total], dtype=jnp.int32)])
    pos = jnp.arange(total, dtype=jnp.int32)
    # bag id of every flat index = number of bag-ends <= position
    bag_ids = jnp.sum(pos[:, None] >= ends[None, :], axis=1).astype(jnp.int32)

    # Lane-dense index rows: pad flat index list to a multiple of 128 lanes.
    pad_len = max(128, ((total + 127) // 128) * 128)
    pad = pad_len - total
    text_row = jnp.pad(text.astype(jnp.int32), (0, pad), constant_values=0)[None, :]
    bag_row = jnp.pad(bag_ids, (0, pad), constant_values=-1)[None, :]   # -1 never matches

    grid = (num_bags // bags_per_block,)
    return pl.pallas_call(
        _emb_bag_kernel,
        out_shape=jax.ShapeDtypeStruct((num_bags, dim), jnp.float32),
        grid=grid,
        in_specs=[
            pl.BlockSpec((1, pad_len), lambda g: (0, 0)),     # text indices
            pl.BlockSpec((1, pad_len), lambda g: (0, 0)),     # bag ids
            pl.BlockSpec((vocab, dim), lambda g: (0, 0)),     # full table resident
        ],
        out_specs=pl.BlockSpec((bags_per_block, dim), lambda g: (g, 0)),
        compiler_params=pltpu.CompilerParams(
            dimension_semantics=("parallel",),                # bags independent per tile
            vmem_limit_bytes=32 * 1024 * 1024,
        ),
    )(text_row, bag_row, emb_table)


def _reference(text, offsets, emb_table):
    total = text.shape[0]
    num_bags = offsets.shape[0]
    offsets_ext = jnp.concatenate([offsets, jnp.array([total], dtype=offsets.dtype)])
    pos = jnp.arange(total)
    seg = jnp.sum(pos[:, None] >= offsets_ext[None, 1:], axis=1)
    gathered = emb_table[text]
    return jax.ops.segment_sum(gathered, seg, num_segments=num_bags)


if __name__ == "__main__":
    key = jax.random.PRNGKey(0)
    k_emb, k_idx = jax.random.split(key)

    # Deterministic parameter init (matches EmbeddingBag default N(0,1) init).
    emb_table = jax.random.normal(k_emb, (VOCAB_SIZE, EMBED_DIM), dtype=jnp.float32)

    # Deterministic inputs: flat index list + bag offsets (variable sizes, some empty).
    text = jax.random.randint(k_idx, (TOTAL_INDICES,), 0, VOCAB_SIZE, dtype=jnp.int32)
    starts, acc = [], 0
    for n in BAG_LENGTHS:
        starts.append(acc)
        acc += n
    offsets = jnp.array(starts, dtype=jnp.int32)

    out = jax.block_until_ready(embedding_bag_sum(text, offsets, emb_table))

    ref = _reference(text, offsets, emb_table)
    assert out.shape == (NUM_BAGS, EMBED_DIM)
    assert jnp.allclose(out, ref, atol=1e-5, rtol=1e-5)

    print("KERNEL_OK")
</pallas_src>

<mosaic_0001>
module attributes {stable_mosaic.version = 11 : i64} {
  func.func @_emb_bag_kernel(%arg0: i32, %arg1: memref<1x128xi32, #tpu.memory_space<vmem>>, %arg2: memref<1x128xi32, #tpu.memory_space<vmem>>, %arg3: memref<64x128xf32, #tpu.memory_space<vmem>>, %arg4: memref<8x128xf32, #tpu.memory_space<vmem>>) attributes {dimension_semantics = [#tpu.dimension_semantics<parallel>], iteration_bounds = array<i64: 2>, scalar_prefetch = 0 : i64, scratch_operands = 0 : i64, tpu.core_type = #tpu.core_type<tc>, window_params = [{pipeline_mode = #tpu.pipeline_mode<synchronous>, transform_indices = @transform_0, window_bounds = array<i64: 1, 128>}, {pipeline_mode = #tpu.pipeline_mode<synchronous>, transform_indices = @transform_1, window_bounds = array<i64: 1, 128>}, {pipeline_mode = #tpu.pipeline_mode<synchronous>, transform_indices = @transform_2, window_bounds = array<i64: 64, 128>}, {transform_indices = @transform_3, window_bounds = array<i64: 8, 128>}]} {
    %c8_i32 = arith.constant 8 : i32
    %0 = arith.muli %arg0, %c8_i32 : i32
    %1 = tpu.iota {dimensions = array<i32: 0>} : vector<8x128xi32>
    %2 = vector.broadcast %0 : i32 to vector<8x128xi32>
    %3 = arith.addi %1, %2 : vector<8x128xi32>
    %c0 = arith.constant 0 : index
    %c0_0 = arith.constant 0 : index
    %4 = vector.load %arg2[%c0, %c0_0] : memref<1x128xi32, #tpu.memory_space<vmem>>, vector<1x128xi32>
    %5 = vector.broadcast %4 : vector<1x128xi32> to vector<8x128xi32>
    %6 = arith.cmpi eq, %3, %5 : vector<8x128xi32>
    %7 = arith.extui %6 : vector<8x128xi1> to vector<8x128xi32>
    %8 = arith.sitofp %7 : vector<8x128xi32> to vector<8x128xf32>
    %9 = tpu.iota {dimensions = array<i32: 0>} : vector<64x128xi32>
    %c0_1 = arith.constant 0 : index
    %c0_2 = arith.constant 0 : index
    %10 = vector.load %arg1[%c0_1, %c0_2] : memref<1x128xi32, #tpu.memory_space<vmem>>, vector<1x128xi32>
    %11 = vector.broadcast %10 : vector<1x128xi32> to vector<64x128xi32>
    %12 = arith.cmpi eq, %9, %11 : vector<64x128xi32>
    %13 = arith.extui %12 : vector<64x128xi1> to vector<64x128xi32>
    %14 = arith.sitofp %13 : vector<64x128xi32> to vector<64x128xf32>
    %cst = arith.constant dense<0.000000e+00> : vector<8x64xf32>
    %15 = tpu.matmul %8, %14, %cst {dimension_numbers = #tpu.dot_dimension_numbers<[1], [1], [0], [0], [0, 0, 1, 0], [], []>} : vector<8x128xf32>, vector<64x128xf32>, vector<8x64xf32> -> vector<8x64xf32>
    %c0_3 = arith.constant 0 : index
    %c0_4 = arith.constant 0 : index
    %16 = vector.load %arg3[%c0_3, %c0_4] : memref<64x128xf32, #tpu.memory_space<vmem>>, vector<64x128xf32>
    %cst_5 = arith.constant dense<0.000000e+00> : vector<8x128xf32>
    %17 = tpu.matmul %15, %16, %cst_5 {dimension_numbers = #tpu.dot_dimension_numbers<[1], [0], [0], [1], [0, 0, 1, 1], [], []>} : vector<8x64xf32>, vector<64x128xf32>, vector<8x128xf32> -> vector<8x128xf32>
    %c0_6 = arith.constant 0 : index
    %c0_7 = arith.constant 0 : index
    %18 = vector.load %arg4[%c0_6, %c0_7] : memref<8x128xf32, #tpu.memory_space<vmem>>, vector<8x128xf32>
    tpu.vector_store %arg4[%c0_6, %c0_7], %17 {strides = array<i32>} : memref<8x128xf32, #tpu.memory_space<vmem>>, vector<8x128xf32>,
    return
  }
  func.func @transform_0(%arg0: i32) -> (i32, i32) {
    %c0_i32 = arith.constant 0 : i32
    %c0_i32_0 = arith.constant 0 : i32
    %c0_i32_1 = arith.constant 0 : i32
    return %c0_i32, %c0_i32_0 : i32, i32
  }
  func.func @transform_1(%arg0: i32) -> (i32, i32) {
    %c0_i32 = arith.constant 0 : i32
    %c0_i32_0 = arith.constant 0 : i32
    %c0_i32_1 = arith.constant 0 : i32
    return %c0_i32, %c0_i32_0 : i32, i32
  }
  func.func @transform_2(%arg0: i32) -> (i32, i32) {
    %c0_i32 = arith.constant 0 : i32
    %c0_i32_0 = arith.constant 0 : i32
    %c0_i32_1 = arith.constant 0 : i32
    return %c0_i32, %c0_i32_0 : i32, i32
  }
  func.func @transform_3(%arg0: i32) -> (i32, i32) {
    %c0_i32 = arith.constant 0 : i32
    %c0_i32_0 = arith.constant 0 : i32
    return %arg0, %c0_i32 : i32, i32
  }
}

</mosaic_0001>

<bundles_post_ra>
// kernel: tpu_custom_call.1
= control target key start
LH: loop header
LB: loop body
LE: loop exit
PB: predicated region body
PF: predicated region fallthrough
CT: control target
= control target key end

     0   :  { %8 = vsyncpa [#allocation3], 0  ;;  %s972_s0 = inlined_call_operand.hbm [shape: s32[1,128], index: 0, kind: input, shape index: {}]   ;;  %s973_s1 = inlined_call_operand.vmem [shape: s32[1,128], index: 1, kind: input, shape index: {}]   ;;  %s974_s2 = inlined_call_operand.hbm [shape: f32[64,128], index: 2, kind: input, shape index: {}]   ;;  %s975_s3 = inlined_call_operand.hbm [shape: f32[16,128], index: 3, kind: output, shape index: {}]  }
   0x1   :  { %9 = vsyncpa [#allocation6], 0 }
   0x2   :  { %10 = vsyncpa [#allocation4], 0 }
   0x3   :  { %12 = vsyncpa [#allocation4 + $0x1], 0  ;;  %s801_s12 = smov 0   ;;  %s803_s13 = smov 0  }
   0x4   :  { %s805_s14 = smov 0   ;;  %s807_s15 = smov 0  }
   0x5 LB: > { %s822_s16 = sadd.s32 4294967295, %s769_s15   ;;  %s462_s17 = sadd.s32 4294967294, %s769_s15   ;;  %s769_s15 = sphi %s807_s15, %s993_s15   ;;  %s765_s14 = sphi %s805_s14, %s992_s14   ;;  %s761_s13 = sphi %s803_s13, %s991_s13   ;;  %s757_s12 = sphi %s801_s12, %s990_s12  }
   0x6   : > { %s826_s18 = sadd.s32 1, %s769_s15   ;;  %s88_s19 = sadd.s32 1, %s765_s14 }
   0x7   : > { %s85_s20 = ssub.s32 %s769_s15, %s826_s18  ;;  %p98_p0 = scmp.ne.s32.totalorder %s765_s14, %s761_s13 }
   0x8   : > { %p86_p1 = scmp.eq.s32.totalorder %s85_s20, 0  ;;  %p99_p2 = scmp.eq.s32.totalorder %s822_s16, 1 }
   0x9   : > { %p104_p3 = scmp.ne.s32.totalorder %s761_s13, %s757_s12  ;;  %p105_p4 = scmp.eq.s32.totalorder %s462_s17, 1 }
   0xa   : > { %s837_s21 = scalar_select %p86_p1, %s765_s14, %s88_s19  }
   0xb   : > { %p839_p5 = por %p99_p2, %p98_p0  ;;  %p843_p6 = por %p105_p4, %p104_p3 }
   0xc   : > { %p463_p7 = scmp.ge.s32.totalorder %s769_s15, 1  ;;  %p112_p8 = scmp.lt.s32.totalorder %s769_s15, 3 }
   0xd   : > { %s979_s22 = scalar_select %p839_p5, 1, 0 }
   0xe   : > { %s980_s23 = scalar_select %p843_p6, 1, 0 }
   0xf   : > { %p976_p9 = scmp.eq.s32.totalorder %s822_s16, 0  ;;  %p850_p10 = pnand %p463_p7, %p112_p8 }
  0x10   : > { %s771_s25 = smov [#allocation2]   ;;  %s772_s27 = smov [#allocation5]  }
  0x11   : > { %s981_s24 = scalar_select %p850_p10, 1, 0 }
  0x12   : > { %s125_s26 = sshll.u32 %s771_s25, 4  ;;  %p586_p11 = pneg %p850_p10  ;;  %s126_s26 = int_to_ptr.vmem [resolvable:$true] %s125_s26 }
  0x13   : > { %s138_s28 = sshll.u32 %s772_s27, 4  ;;  %s643_s5 = scalar_lea.hbm %s972_s0, 16  ;;  %s862_s28 = int_to_ptr.vmem [resolvable:$true] %s138_s28 }
  0x14   : > { %p858_p12 = pnand %p976_p9, %p586_p11  ;;  %p644_p13 = scmp.ne.s32.totalorder %s972_s0, %s643_s5 }
  0x15   : > { %p650_p3 = scmp.lt.u32.totalorder %s643_s5, %s972_s0 }
  0x16   : > { %p645_p0 = pneg %p858_p12 }
  0x18   : > { %p646_p1 = pnand %p645_p0, %p644_p13 }
  0x1a   : > { %p647_p2 = pneg %p646_p1 }
  0x1c   : > { %p652_p4 = pnand %p650_p3, %p647_p2 }
  0x1e   : > { %655 = shalt.err (!%p652_p4)
}
  0x1f   : > { %s656_s10 = scalar_lea.vmem %s126_s26, 16  ;;  %s663_s11 = scalar_lea.vmem %s126_s26, 32 }
  0x20   : > { %p657_p7 = scmp.ne.s32.totalorder %s126_s26, %s656_s10  ;;  %p664_p9 = scmp.lt.s32.totalorder %s126_s26, %s126_s26 }
  0x21   : > { %p665_p6 = scmp.lt.s32.totalorder %s663_s11, %s656_s10 }
  0x22   : > { %p659_p8 = pnand %p657_p7, %p645_p0 }
  0x23   : > { %p666_p5 = por %p665_p6, %p664_p9 }
  0x24   : > { %p660_p11 = pneg %p659_p8 }
  0x26   : > { %p667_p10 = pnand %p666_p5, %p660_p11 }
  0x28   : > { %670 = shalt.err (!%p667_p10)
}
  0x29   : > { %589 = dma.hbm_to_vmem [thread:$0]  (!%p858_p12), %s972_s0, 16, %s126_s26, [#allocation3]  }
  0x2a   : > { %s671_s27 = scalar_lea.hbm %s974_s2, 1024 }
  0x2b   : > { %p672_p13 = scmp.ne.s32.totalorder %s974_s2, %s671_s27  ;;  %p678_p9 = scmp.lt.u32.totalorder %s671_s27, %s974_s2 }
  0x2d   : > { %p674_p6 = pnand %p672_p13, %p645_p0 }
  0x2f   : > { %p675_p5 = pneg %p674_p6 }
  0x31   : > { %p680_p10 = pnand %p678_p9, %p675_p5 }
  0x33   : > { %683 = shalt.err (!%p680_p10)
}
  0x34   : > { %s684_s26 = scalar_lea.vmem %s862_s28, 1024  ;;  %p692_p4 = scmp.lt.s32.totalorder %s862_s28, %s862_s28 }
  0x35   : > { %p685_p1 = scmp.ne.s32.totalorder %s862_s28, %s684_s26  ;;  %p693_p7 = scmp.lt.s32.totalorder %s684_s26, %s684_s26 }
  0x37   : > { %p687_p2 = pnand %p685_p1, %p645_p0  ;;  %p694_p8 = por %p693_p7, %p692_p4 }
  0x39   : > { %p688_p3 = pneg %p687_p2 }
  0x3b   : > { %p695_p11 = pnand %p694_p8, %p688_p3 }
  0x3d   : > { %698 = shalt.err (!%p695_p11)
}
  0x3e   : > { %s773_s7 = smov 128   ;;  %s774_s8 = smov 8  }
  0x3f   : > { %592 = dma.hbm_to_vmem [thread:$0]  (!%p858_p12), %s974_s2, 1024, %s862_s28, [#allocation6], %s773_s7, %s773_s7, %s774_s8  }
  0x40   : > { %p983_p13 = scmp.ne.s32.totalorder %s981_s24, 0 }
  0x41   : > { %p984_p0 = scmp.eq.s32.totalorder (!%p983_p13), %s822_s16, 0 }
  0x42   : > { %154 = sbr.rel (%p983_p13) target bundleno = 554 (0x22a), region = 32 }
  0x49   : > { %744 = dma.done.wait (%p984_p0), [#allocation3], 16   ;;  %p985_p6 = pmov %p984_p0 }
  0x4a   : > { %p986_p5 = pmov %p984_p0 }
  0x4b   : > { %746 = vsyncadd (%p985_p6), [#allocation3], 4294967280 }
  0x4c   : > { %748 = dma.done.wait (%p986_p5), [#allocation6], 1024   ;;  %p987_p9 = pmov %p984_p0 }
  0x4d   : > { %v178_v0 = vlaneseq  ;;  %v775_v1 = vmov 0.0|0.0   ;;  %vm776_vm0 = vmmov 0   ;;  %v777_v3 = vmov 0.0   ;;  %v473_v5 = vld [vmem:[#allocation2] ss:$0 sm:$0xff]  ;;  %v296_v6 = vld [vmem:[#allocation5] sm:$0xff] }
  0x4e   : > { %750 = vsyncadd (%p987_p9), [#allocation6], 4294966272  ;;  %552 = vmatprep.subr.bf16.mxu0 %v775_v1  ;;  %564 = vmatprep.subr.bf16.mxu1 %v775_v1  ;;  %v297_v9 = vld [vmem:[#allocation5 + $0x8] sm:$0xff]  ;;  %v298_v10 = vld [vmem:[#allocation5 + $0x10] sm:$0xff]  ;;  %v778_v12 = vmov 1.0|1.0  }
  0x4f   : > { %v179_v2 = vshrl.u32 %v178_v0, 7  ;;  %530 = vmatprep.mubr.msk.f32.mxu0 %vm776_vm0, %v777_v3  ;;  %549 = vmatprep.mubr.msk.f32.mxu1 %vm776_vm0, %v777_v3  ;;  %v299_v11 = vld [vmem:[#allocation5 + $0x18] sm:$0xff]  ;;  %v565_v13 = vpack.c.bf16 %v297_v9, %v296_v6  ;;  %v300_v15 = vld [vmem:[#allocation5 + $0x20] sm:$0xff]  ;;  %v301_v16 = vld [vmem:[#allocation5 + $0x28] sm:$0xff]  ;;  %s470_s24 = sshll.u32 %s822_s16, 3  ;;  %v779_v28 = vmov 1.0  }
  0x50   : > { %v568_v14 = vpack.c.bf16 %v299_v11, %v298_v10  ;;  %v571_v19 = vpack.c.bf16 %v301_v16, %v300_v15  ;;  %v302_v20 = vld [vmem:[#allocation5 + $0x30] sm:$0xff]  ;;  %v303_v21 = vld [vmem:[#allocation5 + $0x38] sm:$0xff]  ;;  %v180_v25 = vstv %s470_s24  ;;  %vm304_vm14 = vcmask 523264   ;;  %s174_s11 = sand.u32 1, %s761_s13   ;;  %s493_s25 = sshll.u32 %s822_s16, 7 }
  0x51   : > { %v190_v4 = vadd.s32 8, %v179_v2  ;;  %vm202_vm1 = vcmp.eq.s32.totalorder %v179_v2, %v473_v5  ;;  %v191_v7 = vadd.s32 16, %v179_v2  ;;  %v192_v8 = vadd.s32 24, %v179_v2  ;;  %566 = vmatpush3.bf16.msra.mxu1 %v565_v13  ;;  %v471_v27 = vld [vmem:[%s973_s1] ss:$0 sm:$0xff]  ;;  %s469_s17 = sshll.u32 %s174_s11, 3  ;;  %s932_s4 = scalar_lea.hbm %s975_s3, %s493_s25 }
  0x52   : > { %567 = vmatprep.subr.bf16.mxu1 %v775_v1  ;;  %v193_v17 = vadd.s32 32, %v179_v2  ;;  %v194_v18 = vadd.s32 40, %v179_v2  ;;  %v574_v22 = vpack.c.bf16 %v303_v21, %v302_v20  ;;  %v195_v23 = vadd.s32 48, %v179_v2  ;;  %s176_s19 = scalar_lea.vmem [#allocation7], %s469_s17  ;;  %s380_s5 = scalar_lea.sflag [#allocation4], %s174_s11 }
  0x53   : > { %vm203_vm2 = vcmp.eq.s32.totalorder %v190_v4, %v473_v5  ;;  %vm204_vm4 = vcmp.eq.s32.totalorder %v191_v7, %v473_v5  ;;  %vm205_vm5 = vcmp.eq.s32.totalorder %v192_v8, %v473_v5  ;;  %v196_v24 = vadd.s32 56, %v179_v2  ;;  %s393_s20 = sshll.u32 %s176_s19, 4  ;;  %p988_p10 = scmp.ne.s32.totalorder %s979_s22, 0  ;;  %s927_s20 = int_to_ptr.vmem [resolvable:$true] %s393_s20 }
  0x54   : > { %vm553_vm3 = vmpackc.low %vm203_vm2, %vm202_vm1  ;;  %vm206_vm7 = vcmp.eq.s32.totalorder %v193_v17, %v473_v5  ;;  %vm207_vm8 = vcmp.eq.s32.totalorder %v194_v18, %v473_v5  ;;  %vm208_vm10 = vcmp.eq.s32.totalorder %v195_v23, %v473_v5  ;;  %v181_v26 = vadd.s32 %v180_v25, %v179_v2  ;;  %s699_s6 = scalar_lea.vmem %s927_s20, 128  ;;  %s780_s16 = smov [#allocation7]  }
  0x55   : > { %554 = vmatpush3.bf16.xpose.msk.msra.mxu0 %vm553_vm3, %v778_v12  ;;  %vm556_vm6 = vmpackc.low %vm205_vm5, %vm204_vm4  ;;  %569 = vmatpush3.bf16.msra.mxu1 %v568_v14  ;;  %vm209_vm11 = vcmp.eq.s32.totalorder %v196_v24, %v473_v5  ;;  %p700_p12 = scmp.ne.s32.totalorder %s927_s20, %s699_s6  ;;  %s703_s26 = sshll.u32 %s780_s16, 4  ;;  %s704_s26 = int_to_ptr.vmem [resolvable:$false] %s703_s26 }
  0x56   : > { %555 = vmatprep.subr.bf16.mxu0 %v775_v1  ;;  %570 = vmatprep.subr.bf16.mxu1 %v775_v1  ;;  %vm559_vm9 = vmpackc.low %vm207_vm8, %vm206_vm7  ;;  %vm187_vm13 = vcmp.eq.s32.totalorder %v181_v26, %v471_v27  ;;  %s705_s7 = scalar_lea.vmem %s704_s26, 256  ;;  %p706_p3 = scmp.lt.s32.totalorder %s927_s20, %s704_s26 }
  0x57   : > { %vm562_vm12 = vmpackc.low %vm209_vm11, %vm208_vm10  ;;  %p701_p1 = pnand %p700_p12, %p988_p10  ;;  %p707_p4 = scmp.lt.s32.totalorder %s705_s7, %s699_s6 }
  0x59   : > { %572 = vmatpush3.bf16.msra.mxu1 %v571_v19  ;;  %p702_p2 = pneg %p701_p1  ;;  %p708_p7 = por %p707_p4, %p706_p3 }
  0x5a   : > { %573 = vmatprep.subr.bf16.mxu1 %v775_v1 }
  0x5b   : > { %p709_p8 = pnand %p708_p7, %p702_p2 }
  0x5d   : > { %557 = vmatpush3.bf16.xpose.msk.msra.mxu0 %vm556_vm6, %v778_v12  ;;  %575 = vmatpush3.bf16.msra.mxu1 %v574_v22 }
  0x5e   : > { %558 = vmatprep.subr.bf16.mxu0 %v775_v1 }
  0x65   : > { %560 = vmatpush3.bf16.xpose.msk.msra.mxu0 %vm559_vm9, %v778_v12 }
  0x66   : > { %561 = vmatprep.subr.bf16.mxu0 %v775_v1 }
  0x6d   : > { %563 = vmatpush3.bf16.xpose.msk.msra.mxu0 %vm562_vm12, %v778_v12 }
  0x74   : > { %531 = vmatmul.mubr.msk.f32.vlgmr.msra.gmra.mrb[0].mxu0 %vm187_vm13, %v779_v28 }
 0x147   : > { %v292_v29 = vpop.f32.mrb[0].mxu0 }
 0x148   : > { %v532_v30 = vpop.f32.mrb[1].mxu0  ;;  %550 = vmatmul.mubr.msk.f32.vlgmr.msra.gmra.mrb[0].mxu1 %vm304_vm14, %v292_v29 }
 0x21b   : > { %v374_v31 = vpop.f32.mrb[0].mxu1 }
 0x21c   : > { %378 = vst [vmem:[%s176_s19] sm:$0xff] %v374_v31  ;;  %v551_v32 = vpop.f32.mrb[1].mxu1 }
 0x21d   : > { %712 = shalt.err (!%p709_p8)
}
 0x21e   : > { %s713_s8 = scalar_lea.hbm %s932_s4, 128  ;;  %s717_s24 = scalar_lea.hbm %s975_s3, 256 }
 0x21f   : > { %p714_p11 = scmp.ne.s32.totalorder %s932_s4, %s713_s8  ;;  %p718_p6 = scmp.lt.u32.totalorder %s932_s4, %s975_s3 }
 0x220   : > { %p719_p5 = scmp.lt.u32.totalorder %s717_s24, %s713_s8  ;;  %p721_p12 = scmp.lt.u32.totalorder %s713_s8, %s932_s4 }
 0x221   : > { %p715_p13 = pnand %p714_p11, %p988_p10 }
 0x222   : > { %p720_p9 = por %p719_p5, %p718_p6 }
 0x223   : > { %p716_p0 = pneg %p715_p13 }
 0x224   : > { %p722_p1 = por %p721_p12, %p720_p9 }
 0x226   : > { %p723_p2 = pnand %p722_p1, %p716_p0 }
 0x228   : > { %726 = shalt.err (!%p723_p2)
}
 0x229   : > { %584 = dma.vmem_to_hbm [thread:$0]  (%p988_p10), %s927_s20, 128, %s932_s4, %s380_s5  }
 0x22a PF: > { %p601_p3 = scmp.ge.s32.totalorder %s769_s15, 2  ;;  %s405_s11 = sand.u32 1, %s757_s12  }
 0x22b   : > { %p989_p4 = scmp.ne.s32.totalorder %s980_s23, 0  ;;  %s406_s17 = scalar_lea.sflag [#allocation4], %s405_s11 }
 0x22d   : > { %p594_p7 = pnand %p601_p3, %p989_p4 }
 0x22f   : > { %752 = dma.done.wait (!%p594_p7), %s406_s17, 128  }
 0x230   : > { %754 = vsyncadd (!%p594_p7), %s406_s17, 4294967168  ;;  %p15_p8 = scmp.ge.s32.totalorder %s826_s18, 4   ;;  %s990_s12 = smov %s761_s13 }
 0x231   : > { %s991_s13 = smov %s765_s14  ;;  %s992_s14 = smov %s837_s21 }
 0x232   : > { %s993_s15 = smov %s826_s18  ;;  %17 = sbr.rel (!%p15_p8) target bundleno = 5 (0x5), region = 73 }
 0x239   :  { %411 = vsyncpa [#allocation3], 1 }
 0x23a   :  { %413 = vsyncpa [#allocation3 + $0x1], 1 }
 0x23b   :  { %414 = vsyncpa [#allocation6], 1 }
 0x23c   :  { %415 = vsyncpa [#allocation4], 1 }
 0x23d   :  { %417 = vsyncpa [#allocation4 + $0x1], 1 }

</bundles_post_ra>
